<compile_context>
chip_gen: v5e
topology: v5e:2x2
jax: 0.10.0
libtpu: 0.0.40
codegen_flags: <defaults>
</compile_context>

<pallas_src>
import functools

import jax
import jax.numpy as jnp
from jax.experimental import pallas as pl
from jax.experimental.pallas import tpu as pltpu

LANE = 128      # vreg lane width: last dim padded to a multiple of this
SUBLANE = 8     # f32 sublane count: batch padded to a multiple of this


def _round_up(x, m):
    return ((x + m - 1) // m) * m


def _mlp_kernel(x_ref, wh_ref, bh_ref, wo_ref, bo_ref, o_ref, *,
                num_hidden_layers: int):
    """Fused MLP forward: everything resident in VMEM, layers unrolled."""
    h = x_ref[...]                                   # (Mp, P) f32
    for l in range(num_hidden_layers):               # static Python unroll
        acc = jnp.dot(h, wh_ref[l], preferred_element_type=jnp.float32)
        acc = acc + bh_ref[l]                        # (1, P) broadcast over batch
        h = jnp.maximum(acc, 0.0)
    out = jnp.dot(h, wo_ref[...], preferred_element_type=jnp.float32)
    out = out + bo_ref[...]
    o_ref[...] = out.astype(o_ref.dtype)             # lane-dense (Mp, Np) store


def init_params(key, dim_in, dim_out, num_hidden_layers, dim_hidden):
    """Deterministic init mimicking nn.Linear's U(-1/sqrt(fan_in), 1/sqrt(fan_in)).

    Returns unpadded per-layer params: list of (w, b) with w of shape (in, out).
    """
    hidden = []
    for i in range(num_hidden_layers):
        in_size = dim_in if i == 0 else dim_hidden
        key, kw, kb = jax.random.split(key, 3)
        bound = 1.0 / (in_size ** 0.5)
        w = jax.random.uniform(kw, (in_size, dim_hidden), jnp.float32, -bound, bound)
        b = jax.random.uniform(kb, (dim_hidden,), jnp.float32, -bound, bound)
        hidden.append((w, b))
    key, kw, kb = jax.random.split(key, 3)
    bound = 1.0 / (dim_hidden ** 0.5)
    w_out = jax.random.uniform(kw, (dim_hidden, dim_out), jnp.float32, -bound, bound)
    b_out = jax.random.uniform(kb, (dim_out,), jnp.float32, -bound, bound)
    return hidden, (w_out, b_out)


def _pad2(a, rows, cols):
    r, c = a.shape
    return jnp.pad(a, ((0, rows - r), (0, cols - c)))


def pack_params(hidden_params, out_params, dim_in, dim_hidden, dim_out):
    """Zero-pad feature dims to 128 lanes and stack the hidden layers.

    Padding is numerically inert: padded input lanes are zero, padded weight
    rows/cols are zero and padded biases are zero, so ReLU keeps the padding
    at exactly zero through every layer.
    """
    assert len(hidden_params) >= 1
    P = _round_up(max(dim_in, dim_hidden), LANE)   # shared padded feature width
    Np = _round_up(dim_out, LANE)                  # padded output width

    wh = jnp.stack([_pad2(w, P, P) for (w, _) in hidden_params])           # (L, P, P)
    bh = jnp.stack([jnp.pad(b, (0, P - b.shape[0])).reshape(1, P)
                    for (_, b) in hidden_params])                          # (L, 1, P)
    w_out, b_out = out_params
    wo = _pad2(w_out, P, Np)                                               # (P, Np)
    bo = jnp.pad(b_out, (0, Np - b_out.shape[0])).reshape(1, Np)           # (1, Np)
    return wh, bh, wo, bo


def neural_network_forward(x, packed, *, dim_out):
    """Forward pass matching NeuralNetwork.forward as a single fused Pallas kernel."""
    wh, bh, wo, bo = packed
    L, P, _ = wh.shape
    Np = wo.shape[1]

    M, K = x.shape
    Mp = _round_up(M, SUBLANE)
    x_p = jnp.pad(x, ((0, Mp - M), (0, P - K)))

    flops = 2 * Mp * P * (P * L + Np)
    bytes_accessed = 4 * (x_p.size + wh.size + bh.size + wo.size + bo.size + Mp * Np)
    vmem_spec = pl.BlockSpec(memory_space=pltpu.MemorySpace.VMEM)

    out_p = pl.pallas_call(
        functools.partial(_mlp_kernel, num_hidden_layers=L),
        out_shape=jax.ShapeDtypeStruct((Mp, Np), jnp.float32),
        in_specs=[vmem_spec] * 5,
        out_specs=vmem_spec,
        cost_estimate=pl.CostEstimate(
            flops=flops, transcendentals=0, bytes_accessed=bytes_accessed),
    )(x_p, wh, bh, wo, bo)

    # TODO(synk): if batch / feature dims are ever scaled up, switch to a tiled
    # (parallel M / N, arbitrary K) grid with bf16 inputs + f32 accumulation.
    return out_p[:M, :dim_out]


def reference_forward(x, hidden_params, out_params):
    h = x
    for w, b in hidden_params:
        h = jnp.maximum(h @ w + b, 0.0)
    w_out, b_out = out_params
    return h @ w_out + b_out


if __name__ == "__main__":
    # Small shapes consistent with the module: MLP on (batch, dim_in) inputs.
    batch = 8
    dim_in = 32
    dim_hidden = 32
    dim_out = 16
    num_hidden_layers = 3

    key = jax.random.PRNGKey(0)
    key, kx = jax.random.split(key)
    x = jax.random.normal(kx, (batch, dim_in), jnp.float32)

    hidden_params, out_params = init_params(
        key, dim_in, dim_out, num_hidden_layers, dim_hidden)
    packed = pack_params(hidden_params, out_params, dim_in, dim_hidden, dim_out)

    out = neural_network_forward(x, packed, dim_out=dim_out)
    out = jax.block_until_ready(out)

    ref = reference_forward(x, hidden_params, out_params)
    assert out.shape == (batch, dim_out)
    assert jnp.allclose(out, ref, atol=1e-5, rtol=1e-5)

    print("KERNEL_OK")
</pallas_src>

<mosaic_0001>
module attributes {stable_mosaic.version = 11 : i64} {
  func.func @_mlp_kernel(%arg0: memref<8x128xf32, #tpu.memory_space<vmem>>, %arg1: memref<3x128x128xf32, #tpu.memory_space<vmem>>, %arg2: memref<3x1x128xf32, #tpu.memory_space<vmem>>, %arg3: memref<128x128xf32, #tpu.memory_space<vmem>>, %arg4: memref<1x128xf32, #tpu.memory_space<vmem>>, %arg5: memref<8x128xf32, #tpu.memory_space<vmem>>) attributes {dimension_semantics = [], scalar_prefetch = 0 : i64, scratch_operands = 0 : i64, tpu.core_type = #tpu.core_type<tc>} {
    %c0 = arith.constant 0 : index
    %c0_0 = arith.constant 0 : index
    %0 = vector.load %arg0[%c0, %c0_0] : memref<8x128xf32, #tpu.memory_space<vmem>>, vector<8x128xf32>
    %c0_1 = arith.constant 0 : index
    %c0_2 = arith.constant 0 : index
    %c0_3 = arith.constant 0 : index
    %1 = vector.load %arg1[%c0_1, %c0_2, %c0_3] : memref<3x128x128xf32, #tpu.memory_space<vmem>>, vector<1x128x128xf32>
    %2 = vector.shape_cast %1 : vector<1x128x128xf32> to vector<128x128xf32>
    %cst = arith.constant dense<0.000000e+00> : vector<8x128xf32>
    %3 = tpu.matmul %0, %2, %cst {dimension_numbers = #tpu.dot_dimension_numbers<[1], [0], [0], [1], [0, 0, 1, 1], [], []>} : vector<8x128xf32>, vector<128x128xf32>, vector<8x128xf32> -> vector<8x128xf32>
    %c0_4 = arith.constant 0 : index
    %c0_5 = arith.constant 0 : index
    %c0_6 = arith.constant 0 : index
    %4 = vector.load %arg2[%c0_4, %c0_5, %c0_6] : memref<3x1x128xf32, #tpu.memory_space<vmem>>, vector<1x1x128xf32>
    %5 = vector.shape_cast %4 : vector<1x1x128xf32> to vector<1x128xf32>
    %6 = vector.broadcast %5 : vector<1x128xf32> to vector<8x128xf32>
    %7 = arith.addf %3, %6 : vector<8x128xf32>
    %cst_7 = arith.constant 0.000000e+00 : f32
    %8 = vector.broadcast %cst_7 : f32 to vector<8x128xf32>
    %9 = arith.maximumf %7, %8 : vector<8x128xf32>
    %c1 = arith.constant 1 : index
    %c0_8 = arith.constant 0 : index
    %c0_9 = arith.constant 0 : index
    %10 = vector.load %arg1[%c1, %c0_8, %c0_9] : memref<3x128x128xf32, #tpu.memory_space<vmem>>, vector<1x128x128xf32>
    %11 = vector.shape_cast %10 : vector<1x128x128xf32> to vector<128x128xf32>
    %cst_10 = arith.constant dense<0.000000e+00> : vector<8x128xf32>
    %12 = tpu.matmul %9, %11, %cst_10 {dimension_numbers = #tpu.dot_dimension_numbers<[1], [0], [0], [1], [0, 0, 1, 1], [], []>} : vector<8x128xf32>, vector<128x128xf32>, vector<8x128xf32> -> vector<8x128xf32>
    %c1_11 = arith.constant 1 : index
    %c0_12 = arith.constant 0 : index
    %c0_13 = arith.constant 0 : index
    %13 = vector.load %arg2[%c1_11, %c0_12, %c0_13] : memref<3x1x128xf32, #tpu.memory_space<vmem>>, vector<1x1x128xf32>
    %14 = vector.shape_cast %13 : vector<1x1x128xf32> to vector<1x128xf32>
    %15 = vector.broadcast %14 : vector<1x128xf32> to vector<8x128xf32>
    %16 = arith.addf %12, %15 : vector<8x128xf32>
    %cst_14 = arith.constant 0.000000e+00 : f32
    %17 = vector.broadcast %cst_14 : f32 to vector<8x128xf32>
    %18 = arith.maximumf %16, %17 : vector<8x128xf32>
    %c2 = arith.constant 2 : index
    %c0_15 = arith.constant 0 : index
    %c0_16 = arith.constant 0 : index
    %19 = vector.load %arg1[%c2, %c0_15, %c0_16] : memref<3x128x128xf32, #tpu.memory_space<vmem>>, vector<1x128x128xf32>
    %20 = vector.shape_cast %19 : vector<1x128x128xf32> to vector<128x128xf32>
    %cst_17 = arith.constant dense<0.000000e+00> : vector<8x128xf32>
    %21 = tpu.matmul %18, %20, %cst_17 {dimension_numbers = #tpu.dot_dimension_numbers<[1], [0], [0], [1], [0, 0, 1, 1], [], []>} : vector<8x128xf32>, vector<128x128xf32>, vector<8x128xf32> -> vector<8x128xf32>
    %c2_18 = arith.constant 2 : index
    %c0_19 = arith.constant 0 : index
    %c0_20 = arith.constant 0 : index
    %22 = vector.load %arg2[%c2_18, %c0_19, %c0_20] : memref<3x1x128xf32, #tpu.memory_space<vmem>>, vector<1x1x128xf32>
    %23 = vector.shape_cast %22 : vector<1x1x128xf32> to vector<1x128xf32>
    %24 = vector.broadcast %23 : vector<1x128xf32> to vector<8x128xf32>
    %25 = arith.addf %21, %24 : vector<8x128xf32>
    %cst_21 = arith.constant 0.000000e+00 : f32
    %26 = vector.broadcast %cst_21 : f32 to vector<8x128xf32>
    %27 = arith.maximumf %25, %26 : vector<8x128xf32>
    %c0_22 = arith.constant 0 : index
    %c0_23 = arith.constant 0 : index
    %28 = vector.load %arg3[%c0_22, %c0_23] : memref<128x128xf32, #tpu.memory_space<vmem>>, vector<128x128xf32>
    %cst_24 = arith.constant dense<0.000000e+00> : vector<8x128xf32>
    %29 = tpu.matmul %27, %28, %cst_24 {dimension_numbers = #tpu.dot_dimension_numbers<[1], [0], [0], [1], [0, 0, 1, 1], [], []>} : vector<8x128xf32>, vector<128x128xf32>, vector<8x128xf32> -> vector<8x128xf32>
    %c0_25 = arith.constant 0 : index
    %c0_26 = arith.constant 0 : index
    %30 = vector.load %arg4[%c0_25, %c0_26] : memref<1x128xf32, #tpu.memory_space<vmem>>, vector<1x128xf32>
    %31 = vector.broadcast %30 : vector<1x128xf32> to vector<8x128xf32>
    %32 = arith.addf %29, %31 : vector<8x128xf32>
    %c0_27 = arith.constant 0 : index
    %c0_28 = arith.constant 0 : index
    %33 = vector.load %arg5[%c0_27, %c0_28] : memref<8x128xf32, #tpu.memory_space<vmem>>, vector<8x128xf32>
    tpu.vector_store %arg5[%c0_27, %c0_28], %32 {strides = array<i32>} : memref<8x128xf32, #tpu.memory_space<vmem>>, vector<8x128xf32>,
    return
  }
}

</mosaic_0001>

<bundles_post_ra>
// kernel: tpu_custom_call.1
= control target key start
LH: loop header
LB: loop body
LE: loop exit
PB: predicated region body
PF: predicated region fallthrough
CT: control target
= control target key end

     0   :  { %10 = vsyncpa [#allocation3], 0  ;;  %s468_s0 = inlined_call_operand.hbm [shape: f32[8,128], index: 0, kind: input, shape index: {}]   ;;  %s469_s1 = inlined_call_operand.hbm [shape: f32[3,128,128], index: 1, kind: input, shape index: {}]   ;;  %s470_s2 = inlined_call_operand.hbm [shape: f32[3,1,128], index: 2, kind: input, shape index: {}]   ;;  %s471_s3 = inlined_call_operand.hbm [shape: f32[128,128], index: 3, kind: input, shape index: {}]   ;;  %s472_s4 = inlined_call_operand.vmem [shape: f32[1,128], index: 4, kind: input, shape index: {}]   ;;  %s473_s5 = inlined_call_operand.hbm [shape: f32[8,128], index: 5, kind: output, shape index: {}]  }
   0x1   :  { %11 = vsyncpa [#allocation6], 0 }
   0x2   :  { %12 = vsyncpa [#allocation9], 0  ;;  %s29_s20 = sshll.u32 %s469_s1, 4  ;;  %s30_s20 = int_to_ptr.hbm [resolvable:$true] %s29_s20 }
   0x3   :  { %13 = vsyncpa [#allocation4], 0  ;;  %s411_s21 = smov [#allocation5]   ;;  %s19_s25 = sshll.u32 %s468_s0, 4  ;;  %s20_s25 = int_to_ptr.hbm [resolvable:$true] %s19_s25 }
   0x4   :  { %s31_s22 = sshll.u32 %s411_s21, 4  ;;  %s412_s26 = smov 128   ;;  %s32_s22 = int_to_ptr.vmem [resolvable:$true] %s31_s22 }
   0x5   :  { %s413_s27 = smov 8   ;;  %s414_s28 = smov [#allocation2]  }
   0x6   :  { %37 = dma.hbm_to_vmem [thread:$0]  %s30_s20, 6144, %s32_s22, [#allocation6], %s412_s26, %s412_s26, %s413_s27  }
   0x7   :  { %s21_s29 = sshll.u32 %s414_s28, 4  ;;  %s42_s7 = sshll.u32 %s470_s2, 4  ;;  %s22_s29 = int_to_ptr.vmem [resolvable:$true] %s21_s29  ;;  %s43_s7 = int_to_ptr.hbm [resolvable:$true] %s42_s7 }
   0x8   :  { %24 = dma.hbm_to_vmem [thread:$0]  %s20_s25, 128, %s22_s29, [#allocation3]  }
   0x9   :  { %s415_s1 = smov [#allocation7]   ;;  %s55_s0 = sshll.u32 %s471_s3, 4  ;;  %s56_s0 = int_to_ptr.hbm [resolvable:$true] %s55_s0 }
   0xa   :  { %s44_s8 = sshll.u32 %s415_s1, 4  ;;  %s416_s11 = smov 16   ;;  %s45_s8 = int_to_ptr.vmem [resolvable:$true] %s44_s8 }
   0xb   :  { %s417_s12 = smov 1   ;;  %s418_s13 = smov [#allocation8]  }
   0xc   :  { %50 = dma.hbm_to_vmem [thread:$0]  %s43_s7, 48, %s45_s8, [#allocation6], %s416_s11, %s416_s11, %s417_s12  }
   0xd   :  { %s57_s14 = sshll.u32 %s418_s13, 4  ;;  %s58_s14 = int_to_ptr.vmem [resolvable:$true] %s57_s14 }
   0xe   :  { %63 = dma.hbm_to_vmem [thread:$0]  %s56_s0, 2048, %s58_s14, [#allocation9], %s412_s26, %s412_s26, %s413_s27  }
   0xf   :  { %403 = dma.done.wait [#allocation3], 128  }
  0x10   :  { %404 = vsyncadd [#allocation3], 4294967168 }
  0x11   :  { %405 = dma.done.wait [#allocation6], 6192  }
  0x12   :  { %406 = vsyncadd [#allocation6], 4294961104 }
  0x13   :  { %407 = dma.done.wait [#allocation9], 2048  }
  0x14   :  { %408 = vsyncadd [#allocation9], 4294965248  ;;  %v98_v0 = vld [vmem:[#allocation5 + $0x78] sm:$0xff]  ;;  %v97_v1 = vld [vmem:[#allocation5 + $0x70] sm:$0xff]  ;;  %s419_s15 = smov [#allocation10]   ;;  %s258_s19 = sshll.u32 %s473_s5, 4  ;;  %s259_s19 = int_to_ptr.hbm [resolvable:$true] %s258_s19 }
  0x15   :  { %103 = vmatpush.msra.mxu0 %v98_v0  ;;  %v96_v2 = vld [vmem:[#allocation5 + $0x68] sm:$0xff]  ;;  %v95_v3 = vld [vmem:[#allocation5 + $0x60] sm:$0xff]  ;;  %v140_v4 = vld [vmem:[#allocation5 + $0xf8] sm:$0xff]  ;;  %s256_s16 = sshll.u32 %s419_s15, 4  ;;  %s257_s16 = int_to_ptr.vmem [resolvable:$true] %s256_s16 }
  0x16   :  { %v94_v5 = vld [vmem:[#allocation5 + $0x58] sm:$0xff]  ;;  %146 = vmatpush.msra.mxu1 %v140_v4  ;;  %v139_v6 = vld [vmem:[#allocation5 + $0xf0] sm:$0xff]  ;;  %v138_v7 = vld [vmem:[#allocation5 + $0xe8] sm:$0xff] }
  0x17   :  { %104 = vmatpush.msra.mxu0 %v97_v1  ;;  %v93_v8 = vld [vmem:[#allocation5 + $0x50] sm:$0xff]  ;;  %v137_v9 = vld [vmem:[#allocation5 + $0xe0] sm:$0xff]  ;;  %v92_v10 = vld [vmem:[#allocation5 + $0x48] sm:$0xff] }
  0x18   :  { %147 = vmatpush.msra.mxu1 %v139_v6  ;;  %v136_v11 = vld [vmem:[#allocation5 + $0xd8] sm:$0xff]  ;;  %v91_v12 = vld [vmem:[#allocation5 + $0x40] sm:$0xff]  ;;  %v135_v13 = vld [vmem:[#allocation5 + $0xd0] sm:$0xff] }
  0x19   :  { %105 = vmatpush.msra.mxu0 %v96_v2  ;;  %v90_v14 = vld [vmem:[#allocation5 + $0x38] sm:$0xff]  ;;  %v134_v15 = vld [vmem:[#allocation5 + $0xc8] sm:$0xff]  ;;  %v89_v16 = vld [vmem:[#allocation5 + $0x30] sm:$0xff] }
  0x1a   :  { %148 = vmatpush.msra.mxu1 %v138_v7  ;;  %v133_v17 = vld [vmem:[#allocation5 + $0xc0] sm:$0xff]  ;;  %v88_v18 = vld [vmem:[#allocation5 + $0x28] sm:$0xff]  ;;  %v132_v19 = vld [vmem:[#allocation5 + $0xb8] sm:$0xff] }
  0x1b   :  { %106 = vmatpush.msra.mxu0 %v95_v3  ;;  %v87_v20 = vld [vmem:[#allocation5 + $0x20] sm:$0xff]  ;;  %v131_v21 = vld [vmem:[#allocation5 + $0xb0] sm:$0xff]  ;;  %v86_v22 = vld [vmem:[#allocation5 + $0x18] sm:$0xff] }
  0x1c   :  { %149 = vmatpush.msra.mxu1 %v137_v9  ;;  %v130_v23 = vld [vmem:[#allocation5 + $0xa8] sm:$0xff]  ;;  %v85_v24 = vld [vmem:[#allocation5 + $0x10] sm:$0xff]  ;;  %v129_v25 = vld [vmem:[#allocation5 + $0xa0] sm:$0xff] }
  0x1d   :  { %107 = vmatpush.msra.mxu0 %v94_v5  ;;  %v84_v26 = vld [vmem:[#allocation5 + $0x8] sm:$0xff]  ;;  %v128_v27 = vld [vmem:[#allocation5 + $0x98] sm:$0xff]  ;;  %v83_v28 = vld [vmem:[#allocation5] sm:$0xff] }
  0x1e   :  { %150 = vmatpush.msra.mxu1 %v136_v11  ;;  %v82_v29 = vld [vmem:[#allocation2] sm:$0xff]  ;;  %v127_v30 = vld [vmem:[#allocation5 + $0x90] sm:$0xff]  ;;  %v126_v31 = vld [vmem:[#allocation5 + $0x88] sm:$0xff] }
  0x1f   :  { %108 = vmatpush.msra.mxu0 %v93_v8  ;;  %v125_v32 = vld [vmem:[#allocation5 + $0x80] sm:$0xff]  ;;  %v183_v33 = vld [vmem:[#allocation5 + $0x178] sm:$0xff]  ;;  %v182_v34 = vld [vmem:[#allocation5 + $0x170] sm:$0xff] }
  0x20   :  { %151 = vmatpush.msra.mxu1 %v135_v13  ;;  %189 = vmatpush.msra.mxu2 %v183_v33  ;;  %v181_v35 = vld [vmem:[#allocation5 + $0x168] sm:$0xff]  ;;  %v180_v36 = vld [vmem:[#allocation5 + $0x160] sm:$0xff]  ;;  %v179_v37 = vld [vmem:[#allocation5 + $0x158] sm:$0xff] }
  0x21   :  { %109 = vmatpush.msra.mxu0 %v92_v10  ;;  %v178_v38 = vld [vmem:[#allocation5 + $0x150] sm:$0xff]  ;;  %v177_v39 = vld [vmem:[#allocation5 + $0x148] sm:$0xff]  ;;  %v176_v40 = vld [vmem:[#allocation5 + $0x140] sm:$0xff] }
  0x22   :  { %152 = vmatpush.msra.mxu1 %v134_v15  ;;  %190 = vmatpush.msra.mxu2 %v182_v34  ;;  %v175_v41 = vld [vmem:[#allocation5 + $0x138] sm:$0xff]  ;;  %v174_v42 = vld [vmem:[#allocation5 + $0x130] sm:$0xff]  ;;  %v173_v43 = vld [vmem:[#allocation5 + $0x128] sm:$0xff] }
  0x23   :  { %110 = vmatpush.msra.mxu0 %v91_v12  ;;  %v172_v44 = vld [vmem:[#allocation5 + $0x120] sm:$0xff]  ;;  %v171_v45 = vld [vmem:[#allocation5 + $0x118] sm:$0xff]  ;;  %v170_v50 = vld [vmem:[#allocation5 + $0x110] sm:$0xff] }
  0x24   :  { %153 = vmatpush.msra.mxu1 %v133_v17  ;;  %191 = vmatpush.msra.mxu2 %v181_v35  ;;  %v279_v46 = vld [vmem:[#allocation7] ss:$0 sm:$0xff]  ;;  %v169_v51 = vld [vmem:[#allocation5 + $0x108] sm:$0xff]  ;;  %v224_v54 = vld [vmem:[#allocation8 + $0x70] sm:$0xff] }
  0x25   :  { %111 = vmatpush.msra.mxu0 %v90_v14  ;;  %v168_v52 = vld [vmem:[#allocation5 + $0x100] sm:$0xff]  ;;  %v223_v55 = vld [vmem:[#allocation8 + $0x68] sm:$0xff]  ;;  %v220_v58 = vld [vmem:[#allocation8 + $0x50] sm:$0xff] }
  0x26   :  { %154 = vmatpush.msra.mxu1 %v132_v19  ;;  %192 = vmatpush.msra.mxu2 %v180_v36  ;;  %v225_v53 = vld [vmem:[#allocation8 + $0x78] sm:$0xff]  ;;  %v222_v56 = vld [vmem:[#allocation8 + $0x60] sm:$0xff]  ;;  %v219_v59 = vld [vmem:[#allocation8 + $0x48] sm:$0xff] }
  0x27   :  { %112 = vmatpush.msra.mxu0 %v89_v16  ;;  %230 = vmatpush.msra.mxu3 %v225_v53  ;;  %v221_v57 = vld [vmem:[#allocation8 + $0x58] sm:$0xff]  ;;  %v218_v60 = vld [vmem:[#allocation8 + $0x40] sm:$0xff]  ;;  %v216_v62 = vld [vmem:[#allocation8 + $0x30] sm:$0xff] }
  0x28   :  { %155 = vmatpush.msra.mxu1 %v131_v21  ;;  %193 = vmatpush.msra.mxu2 %v179_v37  ;;  %v217_v61 = vld [vmem:[#allocation8 + $0x38] sm:$0xff]  ;;  %v215_v63 = vld [vmem:[#allocation8 + $0x28] sm:$0xff]  ;;  %v214_v0 = vld [vmem:[#allocation8 + $0x20] sm:$0xff] }
  0x29   :  { %113 = vmatpush.msra.mxu0 %v88_v18  ;;  %231 = vmatpush.msra.mxu3 %v224_v54  ;;  %v213_v1 = vld [vmem:[#allocation8 + $0x18] sm:$0xff]  ;;  %v212_v6 = vld [vmem:[#allocation8 + $0x10] sm:$0xff]  ;;  %v211_v7 = vld [vmem:[#allocation8 + $0x8] sm:$0xff] }
  0x2a   :  { %156 = vmatpush.msra.mxu1 %v130_v23  ;;  %194 = vmatpush.msra.mxu2 %v178_v38  ;;  %v280_v2 = vld [vmem:[#allocation7 + $0x1] ss:$0 sm:$0xff]  ;;  %v210_v8 = vld [vmem:[#allocation8] sm:$0xff]  ;;  %v281_v9 = vld [vmem:[#allocation7 + $0x2] ss:$0 sm:$0xff] }
  0x2b   :  { %114 = vmatpush.msra.mxu0 %v87_v20  ;;  %232 = vmatpush.msra.mxu3 %v223_v55  ;;  %v282_v13 = vld [vmem:[%s472_s4] ss:$0 sm:$0xff] }
  0x2c   :  { %157 = vmatpush.msra.mxu1 %v129_v25  ;;  %195 = vmatpush.msra.mxu2 %v177_v39 }
  0x2d   :  { %115 = vmatpush.msra.mxu0 %v86_v22  ;;  %233 = vmatpush.msra.mxu3 %v222_v56 }
  0x2e   :  { %158 = vmatpush.msra.mxu1 %v128_v27  ;;  %196 = vmatpush.msra.mxu2 %v176_v40 }
  0x2f   :  { %116 = vmatpush.msra.mxu0 %v85_v24  ;;  %234 = vmatpush.msra.mxu3 %v221_v57 }
  0x30   :  { %159 = vmatpush.msra.mxu1 %v127_v30  ;;  %197 = vmatpush.msra.mxu2 %v175_v41 }
  0x31   :  { %117 = vmatpush.msra.mxu0 %v84_v26  ;;  %235 = vmatpush.msra.mxu3 %v220_v58 }
  0x32   :  { %160 = vmatpush.msra.mxu1 %v126_v31  ;;  %198 = vmatpush.msra.mxu2 %v174_v42 }
  0x33   :  { %118 = vmatpush.msra.mxu0 %v83_v28  ;;  %236 = vmatpush.msra.mxu3 %v219_v59 }
  0x34   :  { %119 = vmatmul.f32.vlgmr.msra.gmra.mxu0 %v82_v29  ;;  %161 = vmatpush.msra.mxu1 %v125_v32 }
  0x35   :  { %199 = vmatpush.msra.mxu2 %v173_v43  ;;  %237 = vmatpush.msra.mxu3 %v218_v60 }
  0x37   :  { %200 = vmatpush.msra.mxu2 %v172_v44  ;;  %238 = vmatpush.msra.mxu3 %v217_v61 }
  0x39   :  { %201 = vmatpush.msra.mxu2 %v171_v45  ;;  %239 = vmatpush.msra.mxu3 %v216_v62 }
  0x3b   :  { %202 = vmatpush.msra.mxu2 %v170_v50  ;;  %240 = vmatpush.msra.mxu3 %v215_v63 }
  0x3d   :  { %203 = vmatpush.msra.mxu2 %v169_v51  ;;  %241 = vmatpush.msra.mxu3 %v214_v0 }
  0x3f   :  { %204 = vmatpush.msra.mxu2 %v168_v52  ;;  %242 = vmatpush.msra.mxu3 %v213_v1 }
  0x41   :  { %243 = vmatpush.msra.mxu3 %v212_v6 }
  0x43   :  { %244 = vmatpush.msra.mxu3 %v211_v7 }
  0x45   :  { %245 = vmatpush.msra.mxu3 %v210_v8 }
  0xb1   :  { %v120_v47 = vpop.f32.mrf.mxu0 }
  0xb2   :  { %v121_v48 = vadd.f32 %v279_v46, %v120_v47 }
  0xb4   :  { %v123_v49 = vmax.f32 %v121_v48, 0.0 }
  0xb6   :  { %162 = vmatmul.f32.vlgmr.msra.gmra.mxu1 %v123_v49 }
 0x133   :  { %v163_v3 = vpop.f32.mrf.mxu1 }
 0x134   :  { %v164_v4 = vadd.f32 %v280_v2, %v163_v3 }
 0x136   :  { %v166_v5 = vmax.f32 %v164_v4, 0.0 }
 0x138   :  { %205 = vmatmul.f32.vlgmr.msra.gmra.mxu2 %v166_v5 }
 0x1bb   :  { %v206_v10 = vpop.f32.mrf.mxu2 }
 0x1bc   :  { %v207_v11 = vadd.f32 %v281_v9, %v206_v10 }
 0x1be   :  { %v209_v12 = vmax.f32 %v207_v11, 0.0 }
 0x1c0   :  { %246 = vmatmul.f32.vlgmr.msra.gmra.mxu3 %v209_v12 }
 0x243   :  { %v247_v14 = vpop.f32.mrf.mxu3 }
 0x244   :  { %v248_v15 = vadd.f32 %v282_v13, %v247_v14 }
 0x246   :  { %250 = vst [vmem:[#allocation10] sm:$0xff] %v248_v15 }
 0x247   :  { %261 = dma.vmem_to_hbm [thread:$0]  %s257_s16, 128, %s259_s19, [#allocation4]  }
 0x248   :  { %409 = dma.done.wait [#allocation4], 128  }
 0x249   :  { %410 = vsyncadd [#allocation4], 4294967168 }
 0x24a   :  { %266 = vsyncpa [#allocation3], 1 }
 0x24b   :  { %267 = vsyncpa [#allocation6], 1 }
 0x24c   :  { %268 = vsyncpa [#allocation9], 1 }
 0x24d   :  { %269 = vsyncpa [#allocation4], 1 }

</bundles_post_ra>
